<compile_context>
chip_gen: v6e
topology: v6e:2x2x1
jax: 0.10.0
libtpu: 0.0.40
codegen_flags: <defaults>
</compile_context>

<pallas_src>
import math
from typing import NamedTuple

import jax
import jax.numpy as jnp
from jax.experimental import pallas as pl
from jax.experimental.pallas import tpu as pltpu


_LANES = 128          # f32 vreg lane width
_MAX_TILE_ROWS = 1024  # rows per grid step (512 KiB f32 per input buffer)


def _normal_logprob_kernel(z_ref, mu_ref, inv_scale_ref, seg_ref, out_ref):
    # z_ref:         (TILE_R, L)   lane-packed latents (pack batch elems / row)
    # mu_ref:        (1, L)        prior mean, tiled along lanes
    # inv_scale_ref: (1, L)        1/scale, tiled along lanes
    # seg_ref:       (L, pack)     segmented-reduction matrix with -0.5 folded in
    # out_ref:       (TILE_R, pack)  -0.5 * sum_d t^2 per packed batch element
    z = z_ref[...].astype(jnp.float32)
    t = (z - mu_ref[...]) * inv_scale_ref[...]
    out_ref[...] = jnp.dot(t * t, seg_ref[...],
                           preferred_element_type=jnp.float32)


def _normal_logprob(z, mu, scale):
    """log N(z; mu, scale) summed over the last axis (td.Independent(..., 1))."""
    B, D = z.shape
    mu = mu.astype(jnp.float32)
    scale = scale.astype(jnp.float32)

    # Lane packing: put `pack` batch elements side-by-side in one 128-lane row
    # when d_z < 128 (and divides 128) so lanes/VMEM are not padded 128/d_z x.
    if D < _LANES and _LANES % D == 0:
        pack = _LANES // D
    else:
        pack = 1
    lane_width = pack * D

    b_pad = pl.cdiv(B, pack) * pack
    z_in = z
    if b_pad != B:
        z_in = jnp.pad(z, ((0, b_pad - B), (0, 0)))
    rows = b_pad // pack
    z_packed = z_in.reshape(rows, lane_width)  # row-major reshape: no copy

    # Constant prior-parameter work hoisted out of the per-tile loop.
    inv_scale_lane = jnp.tile(1.0 / scale, pack).reshape(1, lane_width)
    mu_lane = jnp.tile(mu, pack).reshape(1, lane_width)
    # Segmented lane-reduction matrix (groups of D lanes), -0.5 folded in; the
    # reduction then runs on the MXU instead of a cross-lane VPU/XLU sum.
    lane_ids = jnp.arange(lane_width, dtype=jnp.int32)[:, None] // D
    grp_ids = jnp.arange(pack, dtype=jnp.int32)[None, :]
    seg = jnp.where(lane_ids == grp_ids, -0.5, 0.0).astype(jnp.float32)
    # Scalar constant: sum_d(-log(scale_d)) - D/2 * log(2*pi), added post-kernel.
    const = -jnp.sum(jnp.log(scale)) - jnp.float32(0.5 * D * math.log(2.0 * math.pi))

    tile_r = rows if rows <= _MAX_TILE_ROWS else _MAX_TILE_ROWS
    grid = (pl.cdiv(rows, tile_r),)

    out = pl.pallas_call(
        _normal_logprob_kernel,
        out_shape=jax.ShapeDtypeStruct((rows, pack), jnp.float32),
        grid_spec=pl.GridSpec(
            grid=grid,
            in_specs=[
                pl.BlockSpec((tile_r, lane_width), lambda i: (i, 0)),
                pl.BlockSpec((1, lane_width), lambda i: (0, 0)),
                pl.BlockSpec((1, lane_width), lambda i: (0, 0)),
                pl.BlockSpec((lane_width, pack), lambda i: (0, 0)),
            ],
            out_specs=pl.BlockSpec((tile_r, pack), lambda i: (i, 0)),
        ),
        compiler_params=pltpu.CompilerParams(
            dimension_semantics=("parallel",),
        ),
    )(z_packed, mu_lane, inv_scale_lane, seg)

    # out[r, g] corresponds to batch element r*pack + g.
    return out.reshape(-1)[:B] + const


class IndependentNormal(NamedTuple):
    """JAX stand-in for td.Independent(td.Normal(loc, scale), 1)."""
    loc: jax.Array
    scale: jax.Array

    def log_prob(self, z):
        return _normal_logprob(z, self.loc, self.scale)

    def sample(self, key, sample_shape=()):
        shape = tuple(sample_shape) + self.loc.shape
        eps = jax.random.normal(key, shape, dtype=jnp.float32)
        return self.loc + self.scale * eps


class NormalPrior:
    """Gaussian Normal prior with zero mean and unit variance."""

    def __init__(self, d_z: int):
        self.d_z = d_z
        # Deterministic parameter init, exactly as in the PyTorch module.
        self.mu = jnp.zeros((d_z,), dtype=jnp.float32)
        self.var = jnp.ones((d_z,), dtype=jnp.float32)

    def __call__(self):
        # forward(): return the prior distribution (scale := var, as in torch code)
        return IndependentNormal(loc=self.mu, scale=self.var)


if __name__ == "__main__":
    d_z = 32
    batch = 8

    prior_module = NormalPrior(d_z)
    prior = prior_module()  # forward pass -> distribution object

    key = jax.random.PRNGKey(0)
    z = jax.random.normal(key, (batch, d_z), dtype=jnp.float32)

    lp = prior.log_prob(z)
    lp = jax.block_until_ready(lp)

    # Reference check in plain JAX (Independent Normal log-prob, sigma := var).
    ref = jnp.sum(
        -0.5 * ((z - prior_module.mu) / prior_module.var) ** 2
        - jnp.log(prior_module.var)
        - 0.5 * jnp.log(2.0 * jnp.pi),
        axis=-1,
    )
    assert lp.shape == (batch,)
    assert jnp.allclose(lp, ref, atol=1e-5, rtol=1e-5)

    print("KERNEL_OK")
</pallas_src>

<mosaic_0001>
module attributes {stable_mosaic.version = 11 : i64} {
  func.func @_normal_logprob_kernel(%arg0: i32, %arg1: memref<2x128xf32, #tpu.memory_space<vmem>>, %arg2: memref<1x128xf32, #tpu.memory_space<vmem>>, %arg3: memref<1x128xf32, #tpu.memory_space<vmem>>, %arg4: memref<128x4xf32, #tpu.memory_space<vmem>>, %arg5: memref<2x4xf32, #tpu.memory_space<vmem>>) attributes {dimension_semantics = [#tpu.dimension_semantics<parallel>], iteration_bounds = array<i64: 1>, scalar_prefetch = 0 : i64, scratch_operands = 0 : i64, tpu.core_type = #tpu.core_type<tc>, window_params = [{transform_indices = @transform_0, window_bounds = array<i64: 2, 128>}, {pipeline_mode = #tpu.pipeline_mode<synchronous>, transform_indices = @transform_1, window_bounds = array<i64: 1, 128>}, {pipeline_mode = #tpu.pipeline_mode<synchronous>, transform_indices = @transform_2, window_bounds = array<i64: 1, 128>}, {pipeline_mode = #tpu.pipeline_mode<synchronous>, transform_indices = @transform_3, window_bounds = array<i64: 128, 4>}, {transform_indices = @transform_4, window_bounds = array<i64: 2, 4>}]} {
    %c0 = arith.constant 0 : index
    %c0_0 = arith.constant 0 : index
    %0 = vector.load %arg1[%c0, %c0_0] : memref<2x128xf32, #tpu.memory_space<vmem>>, vector<2x128xf32>
    %c0_1 = arith.constant 0 : index
    %c0_2 = arith.constant 0 : index
    %1 = vector.load %arg2[%c0_1, %c0_2] : memref<1x128xf32, #tpu.memory_space<vmem>>, vector<1x128xf32>
    %2 = vector.broadcast %1 : vector<1x128xf32> to vector<2x128xf32>
    %3 = arith.subf %0, %2 : vector<2x128xf32>
    %c0_3 = arith.constant 0 : index
    %c0_4 = arith.constant 0 : index
    %4 = vector.load %arg3[%c0_3, %c0_4] : memref<1x128xf32, #tpu.memory_space<vmem>>, vector<1x128xf32>
    %5 = vector.broadcast %4 : vector<1x128xf32> to vector<2x128xf32>
    %6 = arith.mulf %3, %5 : vector<2x128xf32>
    %7 = arith.mulf %6, %6 : vector<2x128xf32>
    %c0_5 = arith.constant 0 : index
    %c0_6 = arith.constant 0 : index
    %8 = vector.load %arg4[%c0_5, %c0_6] : memref<128x4xf32, #tpu.memory_space<vmem>>, vector<128x4xf32>
    %cst = arith.constant dense<0.000000e+00> : vector<2x4xf32>
    %9 = tpu.matmul %7, %8, %cst {dimension_numbers = #tpu.dot_dimension_numbers<[1], [0], [0], [1], [0, 0, 1, 1], [], []>} : vector<2x128xf32>, vector<128x4xf32>, vector<2x4xf32> -> vector<2x4xf32>
    %c0_7 = arith.constant 0 : index
    %c0_8 = arith.constant 0 : index
    %10 = vector.load %arg5[%c0_7, %c0_8] : memref<2x4xf32, #tpu.memory_space<vmem>>, vector<2x4xf32>
    tpu.vector_store %arg5[%c0_7, %c0_8], %9 {strides = array<i32>} : memref<2x4xf32, #tpu.memory_space<vmem>>, vector<2x4xf32>,
    return
  }
  func.func @transform_0(%arg0: i32) -> (i32, i32) {
    %c0_i32 = arith.constant 0 : i32
    %c0_i32_0 = arith.constant 0 : i32
    return %arg0, %c0_i32 : i32, i32
  }
  func.func @transform_1(%arg0: i32) -> (i32, i32) {
    %c0_i32 = arith.constant 0 : i32
    %c0_i32_0 = arith.constant 0 : i32
    %c0_i32_1 = arith.constant 0 : i32
    return %c0_i32, %c0_i32_0 : i32, i32
  }
  func.func @transform_2(%arg0: i32) -> (i32, i32) {
    %c0_i32 = arith.constant 0 : i32
    %c0_i32_0 = arith.constant 0 : i32
    %c0_i32_1 = arith.constant 0 : i32
    return %c0_i32, %c0_i32_0 : i32, i32
  }
  func.func @transform_3(%arg0: i32) -> (i32, i32) {
    %c0_i32 = arith.constant 0 : i32
    %c0_i32_0 = arith.constant 0 : i32
    %c0_i32_1 = arith.constant 0 : i32
    return %c0_i32, %c0_i32_0 : i32, i32
  }
  func.func @transform_4(%arg0: i32) -> (i32, i32) {
    %c0_i32 = arith.constant 0 : i32
    %c0_i32_0 = arith.constant 0 : i32
    return %arg0, %c0_i32 : i32, i32
  }
}

</mosaic_0001>

<bundles_post_ra>
// kernel: tpu_custom_call.1
= control target key start
LH: loop header
LB: loop body
LE: loop exit
PB: predicated region body
PF: predicated region fallthrough
CT: control target
= control target key end

     0   :  { %v217_v1 = vmov 0.0   ;;  %vm218_vm0 = vmmov 0   ;;  %s305_s0 = inlined_call_operand.vmem [shape: f32[2,128], index: 0, kind: input, shape index: {}]   ;;  %s306_s1 = inlined_call_operand.vmem [shape: f32[1,128], index: 1, kind: input, shape index: {}]   ;;  %s307_s2 = inlined_call_operand.vmem [shape: f32[1,128], index: 2, kind: input, shape index: {}]   ;;  %s308_s3 = inlined_call_operand.vmem [shape: f32[128,4], index: 3, kind: input, shape index: {}]   ;;  %s309_s4 = inlined_call_operand.hbm [shape: f32[2,4], index: 4, kind: output, shape index: {}]  }
   0x1   :  { %v51_v0 = vld [vmem:[%s308_s3 + $0x78] sm:$0xff]  ;;  %157 = vmatprep.subr.mxu0 %v217_v1  ;;  %v50_v2 = vld [vmem:[%s308_s3 + $0x70] sm:$0xff]  ;;  %189 = vmatprep.mubr.msk.f32.mxu0 %vm218_vm0, %v217_v1  ;;  %v49_v3 = vld [vmem:[%s308_s3 + $0x68] sm:$0xff] }
   0x2   :  { %158 = vmatpush3.msra.mxu0 %v51_v0  ;;  %v48_v4 = vld [vmem:[%s308_s3 + $0x60] sm:$0xff] }
   0x3   :  { %159 = vmatprep.subr.mxu0 %v217_v1 }
   0x4   :  { %160 = vmatpush3.msra.mxu0 %v50_v2 }
   0x5   :  { %161 = vmatprep.subr.mxu0 %v217_v1 }
   0x6   :  { %162 = vmatpush3.msra.mxu0 %v49_v3 }
   0x7   :  { %9 = vsyncpa [#allocation3], 0  ;;  %163 = vmatprep.subr.mxu0 %v217_v1  ;;  %v47_v5 = vld [vmem:[%s308_s3 + $0x58] sm:$0xff]  ;;  %v46_v6 = vld [vmem:[%s308_s3 + $0x50] sm:$0xff]  ;;  %s219_s24 = smov [#allocation2]   ;;  %vm122_vm1 = vcmask 25600  }
   0x8   :  { %164 = vmatpush3.msra.mxu0 %v48_v4  ;;  %v45_v7 = vld [vmem:[%s308_s3 + $0x48] sm:$0xff]  ;;  %v44_v8 = vld [vmem:[%s308_s3 + $0x40] sm:$0xff]  ;;  %v43_v9 = vld [vmem:[%s308_s3 + $0x38] sm:$0xff]  ;;  %s130_s25 = sshll.u32 %s219_s24, 4  ;;  %s131_s25 = int_to_ptr.vmem [resolvable:$true] %s130_s25 }
   0x9   :  { %165 = vmatprep.subr.mxu0 %v217_v1  ;;  %v42_v10 = vld [vmem:[%s308_s3 + $0x30] sm:$0xff]  ;;  %v18_v11 = vld [vmem:[%s305_s0] sm:$0x3]  ;;  %v41_v13 = vld [vmem:[%s308_s3 + $0x28] sm:$0xff]  ;;  %s195_s26 = scalar_lea.vmem %s131_s25, 32  ;;  %p200_p1 = scmp.lt.s32.totalorder %s131_s25, %s131_s25 }
   0xa   :  { %166 = vmatpush3.msra.mxu0 %v47_v5  ;;  %v138_v12 = vld [vmem:[%s306_s1] ss:$0 sm:$0xff]  ;;  %v39_v17 = vld [vmem:[%s308_s3 + $0x18] sm:$0xff]  ;;  %v38_v18 = vld [vmem:[%s308_s3 + $0x10] sm:$0xff]  ;;  %p196_p0 = scmp.ne.s32.totalorder %s131_s25, %s195_s26  ;;  %p201_p2 = scmp.lt.s32.totalorder %s195_s26, %s195_s26 }
   0xb   :  { %167 = vmatprep.subr.mxu0 %v217_v1  ;;  %v40_v14 = vld [vmem:[%s308_s3 + $0x20] sm:$0xff]  ;;  %v26_v15 = vsub.f32 %v18_v11, %v138_v12  ;;  %v37_v20 = vld [vmem:[%s308_s3 + $0x8] sm:$0xff] }
   0xc   :  { %168 = vmatpush3.msra.mxu0 %v46_v6  ;;  %v139_v16 = vld [vmem:[%s307_s2] ss:$0 sm:$0xff]  ;;  %p202_p3 = por %p201_p2, %p200_p1 }
   0xd   :  { %169 = vmatprep.subr.mxu0 %v217_v1  ;;  %v34_v19 = vmul.f32 %v139_v16, %v26_v15  ;;  %v36_v21 = vld [vmem:[%s308_s3] sm:$0xff] }
   0xe   :  { %170 = vmatpush3.msra.mxu0 %v45_v7  ;;  %p203_p4 = pnand %p202_p3, %p196_p0 }
   0xf   :  { %171 = vmatprep.subr.mxu0 %v217_v1  ;;  %v35_v22 = vmul.f32 %v34_v19, %v34_v19 }
  0x10   :  { %172 = vmatpush3.msra.mxu0 %v44_v8 }
  0x11   :  { %173 = vmatprep.subr.mxu0 %v217_v1 }
  0x12   :  { %174 = vmatpush3.msra.mxu0 %v43_v9 }
  0x13   :  { %175 = vmatprep.subr.mxu0 %v217_v1 }
  0x14   :  { %176 = vmatpush3.msra.mxu0 %v42_v10 }
  0x15   :  { %177 = vmatprep.subr.mxu0 %v217_v1 }
  0x16   :  { %178 = vmatpush3.msra.mxu0 %v41_v13 }
  0x17   :  { %179 = vmatprep.subr.mxu0 %v217_v1 }
  0x18   :  { %180 = vmatpush3.msra.mxu0 %v40_v14 }
  0x19   :  { %181 = vmatprep.subr.mxu0 %v217_v1 }
  0x1a   :  { %182 = vmatpush3.msra.mxu0 %v39_v17 }
  0x1b   :  { %183 = vmatprep.subr.mxu0 %v217_v1 }
  0x1c   :  { %184 = vmatpush3.msra.mxu0 %v38_v18 }
  0x1d   :  { %185 = vmatprep.subr.mxu0 %v217_v1 }
  0x1e   :  { %186 = vmatpush3.msra.mxu0 %v37_v20 }
  0x1f   :  { %187 = vmatprep.subr.mxu0 %v217_v1 }
  0x20   :  { %188 = vmatpush3.msra.mxu0 %v36_v21 }
  0x21   :  { %190 = vmatmul.mubr.f32.vlgmr.msra.gmra.mxu0 %v35_v22 }
  0xe1   :  { %v118_v23 = vpop.f32.mrf.mxu0 }
  0xe2   :  { %123 = vst.msk [vmem:[#allocation2] sm:$0x3] %vm122_vm1, %v118_v23 }
  0xe3   :  { %v191_v24 = vpop.f32.mrf.mxu0 }
  0xe4   :  { %206 = shalt.err (!%p203_p4)
}
  0xe5   :  { %133 = dma.vmem_to_hbm [thread:$0]  %s131_s25, 32, %s309_s4, [#allocation3]  }
  0xe6   :  { %215 = dma.done.wait [#allocation3], 32  }
  0xe7   :  { %216 = vsyncadd [#allocation3], 4294967264 }
  0xe8   :  { %137 = vsyncpa [#allocation3], 1 }

</bundles_post_ra>
